<compile_context>
chip_gen: v7x
topology: tpu7x:2x2x1
jax: 0.10.0
libtpu: 0.0.40
codegen_flags: <defaults>
</compile_context>

<pallas_src>
import functools

import jax
import jax.numpy as jnp
from jax.experimental import pallas as pl
from jax.experimental.pallas import tpu as pltpu

_LANES = 128
_SUBLANES = 8


def _round_up(x, m):
    return ((x + m - 1) // m) * m


def _scannet_kernel(x_ref, w_ref, b_ref, o_ref, acc_ref, *,
                    vocab, tk, need_mask, approx_sigmoid):
    """One (batch_tile, vocab_tile) grid step of sigmoid(x @ w + b).

    x_ref  : [TM, TK]     input tile (VMEM, edge blocks may contain garbage)
    w_ref  : [1, V_pad]   whole lane-dense weight row (VMEM-resident, zero-padded)
    b_ref  : [1, 1]       bias scalar (SMEM)
    o_ref  : [TM, 1]      output tile (revisited across the vocab axis)
    acc_ref: [TM, 128]    f32 partial-sum accumulator (VMEM scratch)
    """
    k = pl.program_id(1)

    @pl.when(k == 0)
    def _init():
        acc_ref[...] = jnp.zeros_like(acc_ref)

    n_chunks = tk // _LANES
    lane = jax.lax.broadcasted_iota(jnp.int32, (1, _LANES), 1)
    base = k * tk                                     # element offset of this vocab tile

    # Fused fold: per 128-lane chunk, cast -> multiply -> (mask) -> accumulate.
    acc = acc_ref[...]                                # [TM, 128] f32, stays in vregs
    for j in range(n_chunks):
        start = pl.multiple_of(base + j * _LANES, _LANES)
        xj = x_ref[:, j * _LANES:(j + 1) * _LANES].astype(jnp.float32)   # [TM, 128]
        wj = w_ref[:, pl.ds(start, _LANES)].astype(jnp.float32)          # [1, 128]
        contrib = xj * wj                             # VPU; broadcasts over sublanes
        if need_mask:
            # Zero lanes past the true vocab size: the edge block's OOB region
            # is unspecified data and must not poison the f32 accumulator.
            contrib = jnp.where(start + lane < vocab, contrib, 0.0)
        acc = acc + contrib
    acc_ref[...] = acc

    @pl.when(k == pl.num_programs(1) - 1)
    def _finalize():
        # Single XLU lane-reduce, bias add, sigmoid (exp on the EUP), store.
        logits = jnp.sum(acc_ref[...], axis=-1, keepdims=True) + b_ref[0, 0]
        o_ref[...] = pl.reciprocal(1.0 + jnp.exp(-logits),
                                   approx=approx_sigmoid).astype(o_ref.dtype)


def scannet_forward(sentence_token, weight, bias, *,
                    tile_m=256, tile_k=8192, approx_sigmoid=False):
    """sigmoid(sentence_token @ weight^T + bias).

    sentence_token: [N, V] float array (f32 or bf16; bf16 halves HBM traffic)
    weight:         nn.Linear(V, 1) weight, any of [1, V], [V, 1], [V]
    bias:           scalar / [1] / [1, 1]
    returns:        [N, 1] in sentence_token.dtype
    """
    assert tile_m % _SUBLANES == 0 and tile_k % _LANES == 0
    n, v = sentence_token.shape

    # Lane-dense weight row, zero-padded to a whole number of vocab tiles.
    # (Tiny; the big [N, V] input is never copied or padded.)
    w_row = jnp.asarray(weight, jnp.float32).reshape(1, v)
    b = jnp.asarray(bias, jnp.float32).reshape(1, 1)

    tk = min(tile_k, _round_up(v, _LANES))            # lane-aligned vocab tile
    grid_k = pl.cdiv(v, tk)
    v_pad = grid_k * tk
    need_mask = (v % tk) != 0
    if v_pad != v:
        w_row = jnp.pad(w_row, ((0, 0), (0, v_pad - v)))

    # Batch tile: aim for >=4 tiles so the "parallel" axis feeds both v7x TCs;
    # a single full-extent tile for tiny batches (any N allowed).
    tm = min(tile_m, _round_up(pl.cdiv(n, 4), _SUBLANES))
    if tm >= n:
        tm = n
    grid_i = pl.cdiv(n, tm)

    x_bytes = jnp.dtype(sentence_token.dtype).itemsize
    cost = pl.CostEstimate(
        flops=2 * n * v,
        transcendentals=n,
        bytes_accessed=n * v * x_bytes + v_pad * 4 + n * x_bytes + 8)

    kernel = functools.partial(
        _scannet_kernel, vocab=v, tk=tk, need_mask=need_mask,
        approx_sigmoid=approx_sigmoid)

    return pl.pallas_call(
        kernel,
        out_shape=jax.ShapeDtypeStruct((n, 1), sentence_token.dtype),
        grid=(grid_i, grid_k),                        # (batch, vocab-reduce last)
        in_specs=[
            # Input tile follows both grid axes (the only large HBM stream).
            pl.BlockSpec((tm, tk), lambda i, k: (i, k)),
            # Whole weight row: block index never changes -> fetched once,
            # stays VMEM-resident; sliced per chunk inside the kernel.
            pl.BlockSpec((1, v_pad), lambda i, k: (0, 0)),
            # Bias scalar in SMEM (no vector DMA).
            pl.BlockSpec(memory_space=pltpu.MemorySpace.SMEM),
        ],
        # Output block fixed across the vocab axis (accumulator pattern).
        out_specs=pl.BlockSpec((tm, 1), lambda i, k: (i, 0)),
        scratch_shapes=[pltpu.VMEM((tm, _LANES), jnp.float32)],
        compiler_params=pltpu.CompilerParams(
            dimension_semantics=("parallel", "arbitrary"),
            # 2x8 MiB x-tile buffers + resident weight + acc ~= 17 MiB: fits the
            # raised scoped limit on v5e/v6e and v7x's 64 MiB physical VMEM.
            vmem_limit_bytes=32 * 1024 * 1024),
        cost_estimate=cost,
    )(sentence_token, w_row, b)


if __name__ == "__main__":
    def reference(x, w, b):
        w32 = jnp.asarray(w, jnp.float32).reshape(1, -1)
        b32 = jnp.asarray(b, jnp.float32).reshape(1, 1)
        return jax.nn.sigmoid(x.astype(jnp.float32) @ w32.T + b32)

    key = jax.random.PRNGKey(0)
    configs = [
        # (batch, vocab, dtype, tile_m, tile_k, atol)
        (8,   64,   jnp.float32, 256, 8192, 1e-5),  # toy module shape, single tile
        (10,  200,  jnp.float32, 256, 8192, 1e-5),  # ragged batch + ragged vocab (mask path)
        (26,  300,  jnp.float32,   8,  128, 1e-5),  # multi batch tiles + multi-step vocab reduction
        (64,  1024, jnp.float32, 256, 8192, 1e-5),  # aligned, no masking
        (24,  384,  jnp.bfloat16,  8,  128, 2e-2),  # bf16 HBM storage of the [N,V] stream
    ]
    for n, v, dt, tm_, tk_, atol in configs:
        key, k_x, k_w, k_b = jax.random.split(key, 4)
        # nn.Linear(V, 1): weight [1, V], bias [1], init U(-1/sqrt(V), 1/sqrt(V)).
        bound = 1.0 / (v ** 0.5)
        weight = jax.random.uniform(k_w, (1, v), jnp.float32,
                                    minval=-bound, maxval=bound)
        bias = jax.random.uniform(k_b, (1,), jnp.float32,
                                  minval=-bound, maxval=bound)
        x = jax.random.normal(k_x, (n, v), jnp.float32).astype(dt)

        out = jax.block_until_ready(
            scannet_forward(x, weight, bias, tile_m=tm_, tile_k=tk_))
        ref = reference(x, weight, bias)
        assert out.shape == (n, 1), (out.shape, n)
        assert jnp.allclose(out.astype(jnp.float32), ref, atol=atol, rtol=atol), \
            ("mismatch", n, v, dt)

    print("KERNEL_OK")
</pallas_src>

<mosaic_0001>
module attributes {stable_mosaic.version = 11 : i64} {
  func.func @_scannet_kernel(%arg0: i32, %arg1: i32, %arg2: memref<8x128xf32, #tpu.memory_space<vmem>>, %arg3: memref<1x128xf32, #tpu.memory_space<vmem>>, %arg4: memref<1x1xf32, #tpu.memory_space<smem>>, %arg5: memref<8x1xf32, #tpu.memory_space<vmem>>, %arg6: memref<8x128xf32, #tpu.memory_space<vmem>>) attributes {dimension_semantics = [#tpu.dimension_semantics<parallel>, #tpu.dimension_semantics<arbitrary>], iteration_bounds = array<i64: 1, 1>, scalar_prefetch = 0 : i64, scratch_operands = 1 : i64, tpu.core_type = #tpu.core_type<tc>, window_params = [{transform_indices = @transform_0, window_bounds = array<i64: 8, 128>}, {pipeline_mode = #tpu.pipeline_mode<synchronous>, transform_indices = @transform_1, window_bounds = array<i64: 1, 128>}, {transform_indices = @transform_2, window_bounds = array<i64: 1, 1>}, {transform_indices = @transform_3, window_bounds = array<i64: 8, 1>}]} {
    %c0_i32 = arith.constant 0 : i32
    %0 = arith.cmpi eq, %arg1, %c0_i32 : i32
    %1 = arith.extui %0 : i1 to i32
    %c0_i32_0 = arith.constant 0 : i32
    %2 = arith.cmpi ne, %1, %c0_i32_0 : i32
    scf.if %2 {
      %cst_10 = arith.constant 0.000000e+00 : f32
      %26 = vector.broadcast %cst_10 : f32 to vector<8x128xf32>
      %c0_11 = arith.constant 0 : index
      %c0_12 = arith.constant 0 : index
      %27 = vector.load %arg6[%c0_11, %c0_12] : memref<8x128xf32, #tpu.memory_space<vmem>>, vector<8x128xf32>
      tpu.vector_store %arg6[%c0_11, %c0_12], %26 {strides = array<i32>} : memref<8x128xf32, #tpu.memory_space<vmem>>, vector<8x128xf32>,
    } else {
    }
    %3 = tpu.iota {dimensions = array<i32: 1>} : vector<1x128xi32>
    %c128_i32 = arith.constant 128 : i32
    %4 = arith.muli %arg1, %c128_i32 : i32
    %c0 = arith.constant 0 : index
    %c0_1 = arith.constant 0 : index
    %5 = vector.load %arg6[%c0, %c0_1] : memref<8x128xf32, #tpu.memory_space<vmem>>, vector<8x128xf32>
    %c0_i32_2 = arith.constant 0 : i32
    %6 = arith.addi %4, %c0_i32_2 : i32
    %7 = tpu.assume_multiple %6, 128 : i32
    %c0_3 = arith.constant 0 : index
    %c0_4 = arith.constant 0 : index
    %8 = vector.load %arg2[%c0_3, %c0_4] : memref<8x128xf32, #tpu.memory_space<vmem>>, vector<8x128xf32>
    %c0_5 = arith.constant 0 : index
    %9 = arith.index_cast %7 : i32 to index
    %10 = vector.load %arg3[%c0_5, %9] : memref<1x128xf32, #tpu.memory_space<vmem>>, vector<1x128xf32>
    %11 = vector.broadcast %10 : vector<1x128xf32> to vector<8x128xf32>
    %12 = arith.mulf %8, %11 : vector<8x128xf32>
    %13 = vector.broadcast %7 : i32 to vector<1x128xi32>
    %14 = arith.addi %13, %3 : vector<1x128xi32>
    %c64_i32 = arith.constant 64 : i32
    %15 = vector.broadcast %c64_i32 : i32 to vector<1x128xi32>
    %16 = arith.cmpi slt, %14, %15 : vector<1x128xi32>
    %cst = arith.constant 0.000000e+00 : f32
    %17 = vector.shape_cast %16 : vector<1x128xi1> to vector<1x128xi1>
    %18 = vector.broadcast %17 : vector<1x128xi1> to vector<8x128xi1>
    %19 = vector.broadcast %cst : f32 to vector<8x128xf32>
    %20 = arith.select %18, %12, %19 : vector<8x128xi1>, vector<8x128xf32>
    %21 = arith.addf %5, %20 : vector<8x128xf32>
    %c0_6 = arith.constant 0 : index
    %c0_7 = arith.constant 0 : index
    %22 = vector.load %arg6[%c0_6, %c0_7] : memref<8x128xf32, #tpu.memory_space<vmem>>, vector<8x128xf32>
    tpu.vector_store %arg6[%c0_6, %c0_7], %21 {strides = array<i32>} : memref<8x128xf32, #tpu.memory_space<vmem>>, vector<8x128xf32>,
    %c0_i32_8 = arith.constant 0 : i32
    %23 = arith.cmpi eq, %arg1, %c0_i32_8 : i32
    %24 = arith.extui %23 : i1 to i32
    %c0_i32_9 = arith.constant 0 : i32
    %25 = arith.cmpi ne, %24, %c0_i32_9 : i32
    scf.if %25 {
      %c0_10 = arith.constant 0 : index
      %c0_11 = arith.constant 0 : index
      %26 = vector.load %arg6[%c0_10, %c0_11] : memref<8x128xf32, #tpu.memory_space<vmem>>, vector<8x128xf32>
      %cst_12 = arith.constant dense<0.000000e+00> : vector<8xf32>
      %27 = vector.multi_reduction <add>, %26, %cst_12 [1] : vector<8x128xf32> to vector<8xf32>
      %28 = vector.shape_cast %27 : vector<8xf32> to vector<8x1xf32>
      %c0_13 = arith.constant 0 : index
      %c0_14 = arith.constant 0 : index
      %29 = memref.load %arg4[%c0_13, %c0_14] : memref<1x1xf32, #tpu.memory_space<smem>>
      %30 = vector.broadcast %29 : f32 to vector<8x1xf32>
      %31 = arith.addf %28, %30 : vector<8x1xf32>
      %cst_15 = arith.constant 0.000000e+00 : f32
      %32 = vector.broadcast %cst_15 : f32 to vector<8x1xf32>
      %33 = arith.subf %32, %31 : vector<8x1xf32>
      %34 = math.exp %33 : vector<8x1xf32>
      %cst_16 = arith.constant 1.000000e+00 : f32
      %35 = vector.broadcast %cst_16 : f32 to vector<8x1xf32>
      %36 = arith.addf %35, %34 : vector<8x1xf32>
      %37 = tpu.reciprocal %36 : vector<8x1xf32> -> vector<8x1xf32>
      %c0_17 = arith.constant 0 : index
      %c0_18 = arith.constant 0 : index
      %38 = vector.load %arg5[%c0_17, %c0_18] : memref<8x1xf32, #tpu.memory_space<vmem>>, vector<8x1xf32>
      tpu.vector_store %arg5[%c0_17, %c0_18], %37 {strides = array<i32>} : memref<8x1xf32, #tpu.memory_space<vmem>>, vector<8x1xf32>,
    } else {
    }
    return
  }
  func.func @transform_0(%arg0: i32, %arg1: i32) -> (i32, i32) {
    %c0_i32 = arith.constant 0 : i32
    return %arg0, %arg1 : i32, i32
  }
  func.func @transform_1(%arg0: i32, %arg1: i32) -> (i32, i32) {
    %c0_i32 = arith.constant 0 : i32
    %c0_i32_0 = arith.constant 0 : i32
    %c0_i32_1 = arith.constant 0 : i32
    return %c0_i32, %c0_i32_0 : i32, i32
  }
  func.func @transform_2(%arg0: i32, %arg1: i32) -> (i32, i32) {
    %c0_i32 = arith.constant 0 : i32
    %c0_i32_0 = arith.constant 0 : i32
    %c0_i32_1 = arith.constant 0 : i32
    return %c0_i32, %c0_i32_0 : i32, i32
  }
  func.func @transform_3(%arg0: i32, %arg1: i32) -> (i32, i32) {
    %c0_i32 = arith.constant 0 : i32
    %c0_i32_0 = arith.constant 0 : i32
    return %arg0, %c0_i32 : i32, i32
  }
}

</mosaic_0001>

<bundles_post_ra>
// kernel: tpu_custom_call.1
= control target key start
LH: loop header
LB: loop body
LE: loop exit
PB: predicated region body
PF: predicated region fallthrough
CT: control target
= control target key end

     0   :  { %9 = vsyncpa [#allocation5], 0  ;;  %s108_s12 = smov [#allocation4]   ;;  %s150_s0 = inlined_call_operand.hbm [shape: f32[8,64], index: 0, kind: input, shape index: {}]   ;;  %s151_s1 = inlined_call_operand.vmem [shape: f32[1,128], index: 1, kind: input, shape index: {}]   ;;  %s152_s2 = inlined_call_operand.<no memory space> [shape: f32[1,1], index: 2, kind: input, shape index: {}]   ;;  %s153_s3 = inlined_call_operand.vmem [shape: f32[8,1], index: 3, kind: output, shape index: {}]  }
   0x1   :  { %s16_s13 = sshll.u32 %s108_s12, 4  ;;  %s84_s16 = scalar_lea.hbm %s150_s0, 128  ;;  %s17_s13 = int_to_ptr.vmem [resolvable:$true] %s16_s13 }
   0x2   :  { %p85_p0 = scmp.ne.s32.totalorder %s150_s0, %s84_s16  ;;  %p88_p1 = scmp.lt.u32.totalorder %s84_s16, %s150_s0 }
   0x4   :  { %p90_p2 = pnand %p88_p1, %p85_p0 }
   0x6   :  { %93 = shalt.err (!%p90_p2)
}
   0x7   :  { %s94_s21 = scalar_lea.vmem %s17_s13, 128  ;;  %p99_p4 = scmp.lt.s32.totalorder %s17_s13, %s17_s13 }
   0x8   :  { %p95_p3 = scmp.ne.s32.totalorder %s17_s13, %s94_s21  ;;  %p100_p5 = scmp.lt.s32.totalorder %s94_s21, %s94_s21 }
   0xa   :  { %p101_p6 = por %p100_p5, %p99_p4 }
   0xc   :  { %p102_p7 = pnand %p101_p6, %p95_p3 }
   0xe   :  { %105 = shalt.err (!%p102_p7)
}
   0xf   :  { %19 = dma.hbm_to_vmem [thread:$0]  %s150_s0, 128, %s17_s13, [#allocation5]  }
  0x10   :  { %106 = dma.done.wait [#allocation5], 128  }
  0x11   :  { %107 = vsyncadd [#allocation5], 4294967168  ;;  %v32_v0 = vlaneseq  ;;  %v36_v2 = vld [vmem:[#allocation4] sm:$0xff]  ;;  %v63_v6 = vstv %s152_s2  ;;  %vm70_vm1 = vcmask 7168  }
  0x12   :  { %v78_v3 = vld [vmem:[%s151_s1] ss:$0 sm:$0xff] }
  0x13   :  { %v33_v1 = vand.u32 127, %v32_v0  ;;  %v47_v4 = vmul.f32 %v78_v3, %v36_v2 }
  0x15   :  { %vm50_vm0 = vcmp.lt.s32.totalorder %v33_v1, 64 }
  0x16   :  { %v53_v5 = vsel %vm50_vm0, %v47_v4, 0.0 }
  0x17   :  { %60 = vadd.xlane.f32.xlu0 %v53_v5 }
  0xa4   :  { %v61_v7 = vpop.xlane.xlu0 %60 }
  0xa5   :  { %v64_v8 = vadd.f32 %v63_v6, %v61_v7 }
  0xa7   :  { %v65_v9 = vsub.f32 0.0, %v64_v8 }
  0xa9   :  { %v66_v10 = vmul.f32 1.442695, %v65_v9 }
  0xab   :  { %80 = vpow2.f32 %v66_v10 }
  0xb5   :  { %v81_v11 = vpop.eup %80 }
  0xb6   :  { %v68_v12 = vadd.f32 1.0, %v81_v11 }
  0xb8   :  { %82 = vrcp.f32 %v68_v12 }
  0xc2   :  { %v83_v13 = vpop.eup %82 }
  0xc3   :  { %71 = vst.msk [vmem:[%s153_s3] sm:$0xff] %vm70_vm1, %v83_v13 }
  0xc4   :  { %76 = vsyncpa [#allocation5], 1 }

</bundles_post_ra>
